<compile_context>
chip_gen: v6e
topology: v6e:2x2x1
jax: 0.10.0
libtpu: 0.0.40
codegen_flags: <defaults>
</compile_context>

<pallas_src>
import jax
import jax.numpy as jnp
from jax.experimental import pallas as pl
from jax.experimental.pallas import tpu as pltpu

N1_LOGICAL, N2_LOGICAL = 400, 200      # torch hidden sizes
N1_PAD, N2_PAD = 512, 256              # lane-aligned (multiples of 128)
OUT_PAD = 128                          # lane-dense padded output width


def _round_up(x, m):
    return ((x + m - 1) // m) * m


def actor_kernel(x_ref, w1_ref, b1_ref, w2_ref, b2_ref, w3_ref, b3_ref, out_ref):
    # Layer 1: Linear(input_size -> 512 padded) + ReLU        (MXU, bf16 x bf16 -> f32)
    x = x_ref[...].astype(jnp.bfloat16)
    l1 = jnp.dot(x, w1_ref[...], preferred_element_type=jnp.float32) + b1_ref[...]
    l1 = jnp.maximum(l1, 0.0)

    # Layer 2: Linear(512 -> 256 padded) + ReLU               (MXU)
    l2 = jnp.dot(l1.astype(jnp.bfloat16), w2_ref[...],
                 preferred_element_type=jnp.float32) + b2_ref[...]
    l2 = jnp.maximum(l2, 0.0)

    # Output layer: Linear(256 -> 128 padded) + Tanh          (MXU)
    # W3/b3 padding is zero, so padded lanes come out as tanh(0) = 0 and are
    # sliced away in the wrapper.  Lane-dense (tb, 128) store.
    out = jnp.dot(l2.astype(jnp.bfloat16), w3_ref[...],
                  preferred_element_type=jnp.float32) + b3_ref[...]
    out_ref[...] = jnp.tanh(out).astype(out_ref.dtype)


def actor_forward(x, params, *, out_size=2, block_b=1024):
    """x: (B, input_size) f32 -> (B, out_size) f32 (tanh actions)."""
    w1, b1, w2, b2, w3, b3 = params
    B, in_size = x.shape

    # Batch tile: sublane-aligned; for mid/large batches pick <= B/2 so the
    # "parallel" batch axis has >= 2 steps (v7x dual-TC); cap at block_b.
    tb = min(block_b, max(8, _round_up(pl.cdiv(B, 2), 8)))
    n_blocks = pl.cdiv(B, tb)
    b_pad = n_blocks * tb
    if b_pad != B:
        x = jnp.pad(x, ((0, b_pad - B), (0, 0)))

    flops = 2 * b_pad * (in_size * N1_PAD + N1_PAD * N2_PAD + N2_PAD * OUT_PAD)
    bytes_accessed = sum(int(a.size) * a.dtype.itemsize
                         for a in (x, w1, b1, w2, b2, w3, b3))
    bytes_accessed += b_pad * OUT_PAD * 4   # output

    const = lambda i: (0, 0)   # weights/biases resident across grid steps

    out = pl.pallas_call(
        actor_kernel,
        out_shape=jax.ShapeDtypeStruct((b_pad, OUT_PAD), jnp.float32),
        grid=(n_blocks,),
        in_specs=[
            pl.BlockSpec((tb, in_size), lambda i: (i, 0)),   # x, batch-tiled
            pl.BlockSpec(w1.shape, const),
            pl.BlockSpec(b1.shape, const),
            pl.BlockSpec(w2.shape, const),
            pl.BlockSpec(b2.shape, const),
            pl.BlockSpec(w3.shape, const),
            pl.BlockSpec(b3.shape, const),
        ],
        out_specs=pl.BlockSpec((tb, OUT_PAD), lambda i: (i, 0)),
        compiler_params=pltpu.CompilerParams(
            dimension_semantics=("parallel",),
            vmem_limit_bytes=16 << 20,
        ),
        cost_estimate=pl.CostEstimate(
            flops=flops,
            transcendentals=b_pad * OUT_PAD,
            bytes_accessed=bytes_accessed,
        ),
    )(x, w1, b1, w2, b2, w3, b3)
    return out[:B, :out_size]


def init_params(key, input_size, output_size=2,
                n1=N1_LOGICAL, n2=N2_LOGICAL, n1_pad=N1_PAD, n2_pad=N2_PAD,
                out_pad=OUT_PAD):
    """Torch nn.Linear default init (U(-1/sqrt(fan_in), +1/sqrt(fan_in))) on the
    logical shapes, zero-padded to lane-aligned sizes.  Weights are stored
    transposed (in_features, out_features) in bf16 (MXU-native); biases f32."""
    ks = jax.random.split(key, 6)

    def uinit(k, shape, fan_in):
        bound = 1.0 / jnp.sqrt(jnp.float32(fan_in))
        return jax.random.uniform(k, shape, jnp.float32, -bound, bound)

    w1 = jnp.zeros((input_size, n1_pad), jnp.float32).at[:, :n1].set(
        uinit(ks[0], (input_size, n1), input_size)).astype(jnp.bfloat16)
    b1 = jnp.zeros((1, n1_pad), jnp.float32).at[:, :n1].set(
        uinit(ks[1], (1, n1), input_size))
    w2 = jnp.zeros((n1_pad, n2_pad), jnp.float32).at[:n1, :n2].set(
        uinit(ks[2], (n1, n2), n1)).astype(jnp.bfloat16)
    b2 = jnp.zeros((1, n2_pad), jnp.float32).at[:, :n2].set(
        uinit(ks[3], (1, n2), n1))
    w3 = jnp.zeros((n2_pad, out_pad), jnp.float32).at[:n2, :output_size].set(
        uinit(ks[4], (n2, output_size), n2)).astype(jnp.bfloat16)
    b3 = jnp.zeros((1, out_pad), jnp.float32).at[:, :output_size].set(
        uinit(ks[5], (1, output_size), n2))
    return (w1, b1, w2, b2, w3, b3)


def actor_reference(x, params, *, out_size=2, n1=N1_LOGICAL, n2=N2_LOGICAL):
    """Pure-JAX reference on the logical (unpadded) network, using the same
    bf16-rounded weights/operands as the kernel but f32 HIGHEST-precision
    matmuls, so agreement with the MXU (bf16 operands, f32 accum) is tight."""
    w1, b1, w2, b2, w3, b3 = params
    hp = jax.lax.Precision.HIGHEST
    f32 = jnp.float32

    xh = x.astype(jnp.bfloat16).astype(f32)
    l1 = jax.nn.relu(jnp.dot(xh, w1[:, :n1].astype(f32), precision=hp) + b1[:, :n1])
    l1h = l1.astype(jnp.bfloat16).astype(f32)
    l2 = jax.nn.relu(jnp.dot(l1h, w2[:n1, :n2].astype(f32), precision=hp) + b2[:, :n2])
    l2h = l2.astype(jnp.bfloat16).astype(f32)
    out = jnp.dot(l2h, w3[:n2, :out_size].astype(f32), precision=hp) + b3[:, :out_size]
    return jnp.tanh(out)


if __name__ == "__main__":
    # Shapes consistent with a DDPG actor (e.g. LunarLanderContinuous:
    # state dim 8, action dim 2), batch = 8.
    B, INPUT_SIZE, OUTPUT_SIZE = 8, 8, 2

    key = jax.random.PRNGKey(0)
    kx, kp = jax.random.split(key)
    x = jax.random.normal(kx, (B, INPUT_SIZE), jnp.float32)
    params = init_params(kp, INPUT_SIZE, OUTPUT_SIZE)

    out = jax.block_until_ready(actor_forward(x, params, out_size=OUTPUT_SIZE))
    ref = actor_reference(x, params, out_size=OUTPUT_SIZE)

    assert out.shape == (B, OUTPUT_SIZE)
    assert jnp.allclose(out, ref, atol=2e-3, rtol=2e-3), (
        float(jnp.max(jnp.abs(out - ref))))
    print("KERNEL_OK")
</pallas_src>

<mosaic_0001>
module attributes {stable_mosaic.version = 11 : i64} {
  func.func @actor_kernel(%arg0: i32, %arg1: memref<8x8xf32, #tpu.memory_space<vmem>>, %arg2: memref<8x512xbf16, #tpu.memory_space<vmem>>, %arg3: memref<1x512xf32, #tpu.memory_space<vmem>>, %arg4: memref<512x256xbf16, #tpu.memory_space<vmem>>, %arg5: memref<1x256xf32, #tpu.memory_space<vmem>>, %arg6: memref<256x128xbf16, #tpu.memory_space<vmem>>, %arg7: memref<1x128xf32, #tpu.memory_space<vmem>>, %arg8: memref<8x128xf32, #tpu.memory_space<vmem>>) attributes {dimension_semantics = [#tpu.dimension_semantics<parallel>], iteration_bounds = array<i64: 1>, scalar_prefetch = 0 : i64, scratch_operands = 0 : i64, tpu.core_type = #tpu.core_type<tc>, window_params = [{transform_indices = @transform_0, window_bounds = array<i64: 8, 8>}, {pipeline_mode = #tpu.pipeline_mode<synchronous>, transform_indices = @transform_1, window_bounds = array<i64: 8, 512>}, {pipeline_mode = #tpu.pipeline_mode<synchronous>, transform_indices = @transform_2, window_bounds = array<i64: 1, 512>}, {pipeline_mode = #tpu.pipeline_mode<synchronous>, transform_indices = @transform_3, window_bounds = array<i64: 512, 256>}, {pipeline_mode = #tpu.pipeline_mode<synchronous>, transform_indices = @transform_4, window_bounds = array<i64: 1, 256>}, {pipeline_mode = #tpu.pipeline_mode<synchronous>, transform_indices = @transform_5, window_bounds = array<i64: 256, 128>}, {pipeline_mode = #tpu.pipeline_mode<synchronous>, transform_indices = @transform_6, window_bounds = array<i64: 1, 128>}, {transform_indices = @transform_7, window_bounds = array<i64: 8, 128>}]} {
    %c0 = arith.constant 0 : index
    %c0_0 = arith.constant 0 : index
    %0 = vector.load %arg1[%c0, %c0_0] : memref<8x8xf32, #tpu.memory_space<vmem>>, vector<8x8xf32>
    %1 = arith.truncf %0 : vector<8x8xf32> to vector<8x8xbf16>
    %c0_1 = arith.constant 0 : index
    %c0_2 = arith.constant 0 : index
    %2 = vector.load %arg2[%c0_1, %c0_2] : memref<8x512xbf16, #tpu.memory_space<vmem>>, vector<8x512xbf16>
    %cst = arith.constant dense<0.000000e+00> : vector<8x512xf32>
    %3 = tpu.matmul %1, %2, %cst {dimension_numbers = #tpu.dot_dimension_numbers<[1], [0], [0], [1], [0, 0, 1, 1], [], []>} : vector<8x8xbf16>, vector<8x512xbf16>, vector<8x512xf32> -> vector<8x512xf32>
    %c0_3 = arith.constant 0 : index
    %c0_4 = arith.constant 0 : index
    %4 = vector.load %arg3[%c0_3, %c0_4] : memref<1x512xf32, #tpu.memory_space<vmem>>, vector<1x512xf32>
    %5 = vector.broadcast %4 : vector<1x512xf32> to vector<8x512xf32>
    %6 = arith.addf %3, %5 : vector<8x512xf32>
    %cst_5 = arith.constant 0.000000e+00 : f32
    %7 = vector.broadcast %cst_5 : f32 to vector<8x512xf32>
    %8 = arith.maximumf %6, %7 : vector<8x512xf32>
    %9 = arith.truncf %8 : vector<8x512xf32> to vector<8x512xbf16>
    %c0_6 = arith.constant 0 : index
    %c0_7 = arith.constant 0 : index
    %10 = vector.load %arg4[%c0_6, %c0_7] : memref<512x256xbf16, #tpu.memory_space<vmem>>, vector<512x256xbf16>
    %cst_8 = arith.constant dense<0.000000e+00> : vector<8x256xf32>
    %11 = tpu.matmul %9, %10, %cst_8 {dimension_numbers = #tpu.dot_dimension_numbers<[1], [0], [0], [1], [0, 0, 1, 1], [], []>} : vector<8x512xbf16>, vector<512x256xbf16>, vector<8x256xf32> -> vector<8x256xf32>
    %c0_9 = arith.constant 0 : index
    %c0_10 = arith.constant 0 : index
    %12 = vector.load %arg5[%c0_9, %c0_10] : memref<1x256xf32, #tpu.memory_space<vmem>>, vector<1x256xf32>
    %13 = vector.broadcast %12 : vector<1x256xf32> to vector<8x256xf32>
    %14 = arith.addf %11, %13 : vector<8x256xf32>
    %cst_11 = arith.constant 0.000000e+00 : f32
    %15 = vector.broadcast %cst_11 : f32 to vector<8x256xf32>
    %16 = arith.maximumf %14, %15 : vector<8x256xf32>
    %17 = arith.truncf %16 : vector<8x256xf32> to vector<8x256xbf16>
    %c0_12 = arith.constant 0 : index
    %c0_13 = arith.constant 0 : index
    %18 = vector.load %arg6[%c0_12, %c0_13] : memref<256x128xbf16, #tpu.memory_space<vmem>>, vector<256x128xbf16>
    %cst_14 = arith.constant dense<0.000000e+00> : vector<8x128xf32>
    %19 = tpu.matmul %17, %18, %cst_14 {dimension_numbers = #tpu.dot_dimension_numbers<[1], [0], [0], [1], [0, 0, 1, 1], [], []>} : vector<8x256xbf16>, vector<256x128xbf16>, vector<8x128xf32> -> vector<8x128xf32>
    %c0_15 = arith.constant 0 : index
    %c0_16 = arith.constant 0 : index
    %20 = vector.load %arg7[%c0_15, %c0_16] : memref<1x128xf32, #tpu.memory_space<vmem>>, vector<1x128xf32>
    %21 = vector.broadcast %20 : vector<1x128xf32> to vector<8x128xf32>
    %22 = arith.addf %19, %21 : vector<8x128xf32>
    %23 = math.tanh %22 : vector<8x128xf32>
    %c0_17 = arith.constant 0 : index
    %c0_18 = arith.constant 0 : index
    %24 = vector.load %arg8[%c0_17, %c0_18] : memref<8x128xf32, #tpu.memory_space<vmem>>, vector<8x128xf32>
    tpu.vector_store %arg8[%c0_17, %c0_18], %23 {strides = array<i32>} : memref<8x128xf32, #tpu.memory_space<vmem>>, vector<8x128xf32>,
    return
  }
  func.func @transform_0(%arg0: i32) -> (i32, i32) {
    %c0_i32 = arith.constant 0 : i32
    %c0_i32_0 = arith.constant 0 : i32
    return %arg0, %c0_i32 : i32, i32
  }
  func.func @transform_1(%arg0: i32) -> (i32, i32) {
    %c0_i32 = arith.constant 0 : i32
    %c0_i32_0 = arith.constant 0 : i32
    %c0_i32_1 = arith.constant 0 : i32
    return %c0_i32, %c0_i32_0 : i32, i32
  }
  func.func @transform_2(%arg0: i32) -> (i32, i32) {
    %c0_i32 = arith.constant 0 : i32
    %c0_i32_0 = arith.constant 0 : i32
    %c0_i32_1 = arith.constant 0 : i32
    return %c0_i32, %c0_i32_0 : i32, i32
  }
  func.func @transform_3(%arg0: i32) -> (i32, i32) {
    %c0_i32 = arith.constant 0 : i32
    %c0_i32_0 = arith.constant 0 : i32
    %c0_i32_1 = arith.constant 0 : i32
    return %c0_i32, %c0_i32_0 : i32, i32
  }
  func.func @transform_4(%arg0: i32) -> (i32, i32) {
    %c0_i32 = arith.constant 0 : i32
    %c0_i32_0 = arith.constant 0 : i32
    %c0_i32_1 = arith.constant 0 : i32
    return %c0_i32, %c0_i32_0 : i32, i32
  }
  func.func @transform_5(%arg0: i32) -> (i32, i32) {
    %c0_i32 = arith.constant 0 : i32
    %c0_i32_0 = arith.constant 0 : i32
    %c0_i32_1 = arith.constant 0 : i32
    return %c0_i32, %c0_i32_0 : i32, i32
  }
  func.func @transform_6(%arg0: i32) -> (i32, i32) {
    %c0_i32 = arith.constant 0 : i32
    %c0_i32_0 = arith.constant 0 : i32
    %c0_i32_1 = arith.constant 0 : i32
    return %c0_i32, %c0_i32_0 : i32, i32
  }
  func.func @transform_7(%arg0: i32) -> (i32, i32) {
    %c0_i32 = arith.constant 0 : i32
    %c0_i32_0 = arith.constant 0 : i32
    return %arg0, %c0_i32 : i32, i32
  }
}

</mosaic_0001>

<bundles_post_ra>
// kernel: tpu_custom_call.1
= control target key start
LH: loop header
LB: loop body
LE: loop exit
PB: predicated region body
PF: predicated region fallthrough
CT: control target
= control target key end

     0   :  { %12 = vsyncpa [#allocation3], 0  ;;  %s1372_s0 = inlined_call_operand.hbm [shape: f32[8,8], index: 0, kind: input, shape index: {}]   ;;  %s1373_s1 = inlined_call_operand.hbm [shape: bf16[8,512], index: 1, kind: input, shape index: {}]   ;;  %s1374_s2 = inlined_call_operand.hbm [shape: f32[1,512], index: 2, kind: input, shape index: {}]   ;;  %s1375_s3 = inlined_call_operand.hbm [shape: bf16[512,256], index: 3, kind: input, shape index: {}]   ;;  %s1376_s4 = inlined_call_operand.vmem [shape: f32[1,256], index: 4, kind: input, shape index: {}]   ;;  %s1377_s5 = inlined_call_operand.hbm [shape: bf16[256,128], index: 5, kind: input, shape index: {}]   ;;  %s1378_s6 = inlined_call_operand.vmem [shape: f32[1,128], index: 6, kind: input, shape index: {}]   ;;  %s1379_s7 = inlined_call_operand.hbm [shape: f32[8,128], index: 7, kind: output, shape index: {}]  }
   0x1   :  { %13 = vsyncpa [#allocation6], 0 }
   0x2   :  { %14 = vsyncpa [#allocation9], 0 }
   0x3   :  { %15 = vsyncpa [#allocation4], 0  ;;  %s1277_s24 = smov [#allocation5]   ;;  %s1278_s26 = smov [#allocation8]  }
   0x4   :  { %s32_s25 = sshll.u32 %s1277_s24, 4  ;;  %s51_s27 = sshll.u32 %s1278_s26, 4  ;;  %s33_s25 = int_to_ptr.vmem [resolvable:$true] %s32_s25  ;;  %s52_s27 = int_to_ptr.vmem [resolvable:$true] %s51_s27 }
   0x5   :  { %s1157_s28 = scalar_lea.vmem %s33_s25, 256  ;;  %p1162_p1 = scmp.lt.s32.totalorder %s33_s25, %s33_s25 }
   0x6   :  { %p1158_p0 = scmp.ne.s32.totalorder %s33_s25, %s1157_s28  ;;  %p1163_p2 = scmp.lt.s32.totalorder %s1157_s28, %s1157_s28 }
   0x8   :  { %p1164_p3 = por %p1163_p2, %p1162_p1 }
   0xa   :  { %p1165_p4 = pnand %p1164_p3, %p1158_p0 }
   0xc   :  { %1168 = shalt.err (!%p1165_p4)
}
   0xd   :  { %35 = dma.hbm_to_vmem [thread:$0]  %s1373_s1, 256, %s33_s25, [#allocation6]  }
   0xe   :  { %s1177_s8 = scalar_lea.vmem %s52_s27, 8192  ;;  %p1182_p6 = scmp.lt.s32.totalorder %s52_s27, %s52_s27 }
   0xf   :  { %p1178_p5 = scmp.ne.s32.totalorder %s52_s27, %s1177_s8  ;;  %p1183_p7 = scmp.lt.s32.totalorder %s1177_s8, %s1177_s8 }
  0x11   :  { %p1184_p8 = por %p1183_p7, %p1182_p6 }
  0x13   :  { %p1185_p9 = pnand %p1184_p8, %p1178_p5 }
  0x15   :  { %1188 = shalt.err (!%p1185_p9)
}
  0x16   :  { %s1279_s9 = smov 128   ;;  %s1280_s10 = smov 8  }
  0x17   :  { %57 = dma.hbm_to_vmem [thread:$0]  %s1375_s3, 8192, %s52_s27, [#allocation9], %s1279_s9, %s1279_s9, %s1280_s10  }
  0x18   :  { %s1281_s13 = smov [#allocation2]   ;;  %s1282_s15 = smov [#allocation7]  }
  0x19   :  { %s22_s14 = sshll.u32 %s1281_s13, 4  ;;  %s42_s16 = sshll.u32 %s1282_s15, 4  ;;  %s23_s14 = int_to_ptr.vmem [resolvable:$true] %s22_s14  ;;  %s43_s16 = int_to_ptr.vmem [resolvable:$true] %s42_s16 }
  0x1a   :  { %s1197_s1 = scalar_lea.vmem %s23_s14, 128  ;;  %p1202_p11 = scmp.lt.s32.totalorder %s23_s14, %s23_s14 }
  0x1b   :  { %p1198_p10 = scmp.ne.s32.totalorder %s23_s14, %s1197_s1  ;;  %p1203_p12 = scmp.lt.s32.totalorder %s1197_s1, %s1197_s1 }
  0x1d   :  { %p1204_p13 = por %p1203_p12, %p1202_p11 }
  0x1f   :  { %p1205_p0 = pnand %p1204_p13, %p1198_p10 }
  0x21   :  { %1208 = shalt.err (!%p1205_p0)
}
  0x22   :  { %25 = dma.hbm_to_vmem [thread:$0]  %s1372_s0, 128, %s23_s14, [#allocation3]  }
  0x23   :  { %s1217_s19 = scalar_lea.vmem %s43_s16, 64  ;;  %p1222_p2 = scmp.lt.s32.totalorder %s43_s16, %s43_s16 }
  0x24   :  { %p1218_p1 = scmp.ne.s32.totalorder %s43_s16, %s1217_s19  ;;  %p1223_p3 = scmp.lt.s32.totalorder %s1217_s19, %s1217_s19 }
  0x26   :  { %p1224_p4 = por %p1223_p3, %p1222_p2 }
  0x28   :  { %p1225_p5 = pnand %p1224_p4, %p1218_p1 }
  0x2a   :  { %1228 = shalt.err (!%p1225_p5)
}
  0x2b   :  { %45 = dma.hbm_to_vmem [thread:$0]  %s1374_s2, 64, %s43_s16, [#allocation6]  }
  0x2c   :  { %s1283_s21 = smov [#allocation10]  }
  0x2d   :  { %s65_s22 = sshll.u32 %s1283_s21, 4  ;;  %s66_s22 = int_to_ptr.vmem [resolvable:$true] %s65_s22 }
  0x2e   :  { %s1237_s23 = scalar_lea.vmem %s66_s22, 2048  ;;  %p1242_p7 = scmp.lt.s32.totalorder %s66_s22, %s66_s22 }
  0x2f   :  { %p1238_p6 = scmp.ne.s32.totalorder %s66_s22, %s1237_s23  ;;  %p1243_p8 = scmp.lt.s32.totalorder %s1237_s23, %s1237_s23 }
  0x31   :  { %p1244_p9 = por %p1243_p8, %p1242_p7 }
  0x33   :  { %p1245_p10 = pnand %p1244_p9, %p1238_p6 }
  0x35   :  { %1248 = shalt.err (!%p1245_p10)
}
  0x36   :  { %s1284_s0 = smov 64   ;;  %s1285_s24 = smov 4  }
  0x37   :  { %71 = dma.hbm_to_vmem [thread:$0]  %s1377_s5, 2048, %s66_s22, [#allocation9], %s1284_s0, %s1284_s0, %s1285_s24  }
  0x38   :  { %1269 = dma.done.wait [#allocation3], 128  }
  0x39   :  { %1270 = vsyncadd [#allocation3], 4294967168 }
  0x3a   :  { %1271 = dma.done.wait [#allocation6], 320  }
  0x3b   :  { %1272 = vsyncadd [#allocation6], 4294966976 }
  0x3c   :  { %1273 = dma.done.wait [#allocation9], 10240  }
  0x3d   :  { %1274 = vsyncadd [#allocation9], 4294957056  ;;  %v1286_v0 = vmov 0   ;;  %v92_v1 = vld [vmem:[#allocation5] sm:$0xff]  ;;  %vm130_vm0 = vcmask 1043456   ;;  %v90_v2 = vld [vmem:[#allocation2] sm:$0xff] }
  0x3e   :  { %175 = vmatprep.mubr.bf16.mxu1 %v1286_v0  ;;  %v93_v3 = vld [vmem:[#allocation5 + $0x8] sm:$0xff]  ;;  %v910_v4 = vcombine.high %v92_v1, %v92_v1  ;;  %v909_v5 = vcombine.low %v92_v1, %v92_v1  ;;  %v91_v11 = vpack.c.bf16 %v90_v2, %v90_v2  ;;  %v1038_v12 = vld [vmem:[#allocation8 + $0x64] ss:$8 sps:$4 sm:$0xff]   ;;  %vm126_vm1 = vcmask 64512   ;;  %v1040_v14 = vld [vmem:[#allocation8 + $0x60] ss:$8 sps:$4 sm:$0xff]  }
  0x3f   :  { %v912_v6 = vcombine.high %v93_v3, %v93_v3  ;;  %v1035_v7 = vld [vmem:[#allocation8 + $0x74] ss:$8 sps:$4 sm:$0xff]   ;;  %v911_v8 = vcombine.low %v93_v3, %v93_v3  ;;  %v1037_v9 = vld [vmem:[#allocation8 + $0x70] ss:$8 sps:$4 sm:$0xff]   ;;  %v1047_v18 = vld [vmem:[#allocation8 + $0x44] ss:$8 sps:$4 sm:$0xff]  }
  0x40   :  { %913 = vmatprep.subr.msk.bf16.mxu1 %vm130_vm0, %v910_v4  ;;  %v132_v10 = vsel %vm130_vm0, %v909_v5, 0  ;;  %629 = vmatprep.subr.bf16.mxu0 %v1035_v7  ;;  %v1045_v15 = vld [vmem:[#allocation8 + $0x174] ss:$8 sps:$4 sm:$0xff]   ;;  %v1046_v17 = vld [vmem:[#allocation8 + $0x50] ss:$8 sps:$4 sm:$0xff]   ;;  %s1287_s28 = smov [#allocation11]  }
  0x41   :  { %158 = vmatpush1.bf16.msra.mxu1 %v132_v10  ;;  %630 = vmatpush1.bf16.msra.mxu0 %v1037_v9  ;;  %v138_v13 = vsel %vm130_vm0, %v911_v8, 0  ;;  %v1041_v16 = vld [vmem:[#allocation8 + $0x54] ss:$8 sps:$4 sm:$0xff]   ;;  %v1043_v19 = vld [vmem:[#allocation8 + $0x170] ss:$8 sps:$4 sm:$0xff]   ;;  %s898_s29 = sshll.u32 %s1287_s28, 4  ;;  %s899_s29 = int_to_ptr.vmem [resolvable:$true] %s898_s29 }
  0x42   :  { %915 = vmatprep.subr.msk.bf16.mxu1 %vm130_vm0, %v912_v6  ;;  %631 = vmatprep.subr.bf16.mxu0 %v1038_v12  ;;  %v1051_v20 = vld [vmem:[#allocation8 + $0x164] ss:$8 sps:$4 sm:$0xff]   ;;  %v1052_v21 = vld [vmem:[#allocation8 + $0x40] ss:$8 sps:$4 sm:$0xff]   ;;  %v1053_v22 = vld [vmem:[#allocation8 + $0x34] ss:$8 sps:$4 sm:$0xff]   ;;  %v96_v12 = vlaneseq  ;;  %p1254_p12 = scmp.lt.s32.totalorder %s899_s29, %s899_s29 }
  0x43   :  { %v1049_v23 = vld [vmem:[#allocation8 + $0x160] ss:$8 sps:$4 sm:$0xff]   ;;  %v1057_v24 = vld [vmem:[#allocation8 + $0x154] ss:$8 sps:$4 sm:$0xff]   ;;  %v1058_v25 = vld [vmem:[#allocation8 + $0x30] ss:$8 sps:$4 sm:$0xff]  }
  0x44   :  { %914 = vmatmul.mubr.msk.bf16.vlgmr.msra.gmra.mxu1 %vm126_vm1, %v91_v11  ;;  %v1059_v26 = vld [vmem:[#allocation8 + $0x24] ss:$8 sps:$4 sm:$0xff]   ;;  %v1055_v27 = vld [vmem:[#allocation8 + $0x150] ss:$8 sps:$4 sm:$0xff]   ;;  %v1064_v29 = vld [vmem:[#allocation8 + $0x20] ss:$8 sps:$4 sm:$0xff]  }
  0x45   :  { %199 = vmatpush1.bf16.msra.mxu1 %v138_v13  ;;  %216 = vmatprep.mubr.bf16.mxu1 %v1286_v0  ;;  %v1063_v28 = vld [vmem:[#allocation8 + $0x144] ss:$8 sps:$4 sm:$0xff]   ;;  %v1065_v30 = vld [vmem:[#allocation8 + $0x14] ss:$8 sps:$4 sm:$0xff]   ;;  %v1061_v31 = vld [vmem:[#allocation8 + $0x140] ss:$8 sps:$4 sm:$0xff]  }
  0x46   :  { %632 = vmatpush1.bf16.msra.mxu0 %v1040_v14  ;;  %670 = vmatprep.subr.bf16.mxu1 %v1045_v15  ;;  %v1069_v32 = vld [vmem:[#allocation8 + $0x134] ss:$8 sps:$4 sm:$0xff]   ;;  %v1070_v33 = vld [vmem:[#allocation8 + $0x10] ss:$8 sps:$4 sm:$0xff]   ;;  %v1071_v34 = vld [vmem:[#allocation8 + $0x4] ss:$8 sps:$4 sm:$0xff]  }
  0x47   :  { %633 = vmatprep.subr.bf16.mxu0 %v1041_v16  ;;  %v1067_v35 = vld [vmem:[#allocation8 + $0x130] ss:$8 sps:$4 sm:$0xff]   ;;  %v1075_v36 = vld [vmem:[#allocation8 + $0x124] ss:$8 sps:$4 sm:$0xff]   ;;  %v1076_v37 = vld [vmem:[#allocation8] ss:$8 sps:$4 sm:$0xff]  }
  0x48   :  { %v1077_v38 = vld [vmem:[#allocation8 + $0xf4] ss:$8 sps:$4 sm:$0xff]   ;;  %v1073_v39 = vld [vmem:[#allocation8 + $0x120] ss:$8 sps:$4 sm:$0xff]   ;;  %v1082_v41 = vld [vmem:[#allocation8 + $0xf0] ss:$8 sps:$4 sm:$0xff]  }
  0x49   :  { %v1081_v40 = vld [vmem:[#allocation8 + $0x114] ss:$8 sps:$4 sm:$0xff]   ;;  %v1083_v42 = vld [vmem:[#allocation8 + $0xe4] ss:$8 sps:$4 sm:$0xff]   ;;  %v1079_v43 = vld [vmem:[#allocation8 + $0x110] ss:$8 sps:$4 sm:$0xff]  }
  0x4a   :  { %634 = vmatpush1.bf16.msra.mxu0 %v1046_v17  ;;  %v1087_v44 = vld [vmem:[#allocation8 + $0x104] ss:$8 sps:$4 sm:$0xff]   ;;  %v1088_v45 = vld [vmem:[#allocation8 + $0xe0] ss:$8 sps:$4 sm:$0xff]   ;;  %v1089_v46 = vld [vmem:[#allocation8 + $0xd4] ss:$8 sps:$4 sm:$0xff]  }
  0x4b   :  { %635 = vmatprep.subr.bf16.mxu0 %v1047_v18  ;;  %v1085_v47 = vld [vmem:[#allocation8 + $0x100] ss:$8 sps:$4 sm:$0xff]   ;;  %v1093_v48 = vld [vmem:[#allocation8 + $0x1f4] ss:$8 sps:$4 sm:$0xff]   ;;  %v1094_v49 = vld [vmem:[#allocation8 + $0xd0] ss:$8 sps:$4 sm:$0xff]  }
  0x4c   :  { %916 = vmatmul.mubr.msk.bf16.vlgmr.msra.gmra.mxu1 %vm126_vm1, %v91_v11  ;;  %v1095_v50 = vld [vmem:[#allocation8 + $0xc4] ss:$8 sps:$4 sm:$0xff]   ;;  %v1091_v51 = vld [vmem:[#allocation8 + $0x1f0] ss:$8 sps:$4 sm:$0xff]   ;;  %v1100_v53 = vld [vmem:[#allocation8 + $0xc0] ss:$8 sps:$4 sm:$0xff]  }
  0x4d   :  { %671 = vmatpush1.bf16.msra.mxu1 %v1043_v19  ;;  %v1099_v52 = vld [vmem:[#allocation8 + $0x1e4] ss:$8 sps:$4 sm:$0xff]   ;;  %v1101_v54 = vld [vmem:[#allocation8 + $0xb4] ss:$8 sps:$4 sm:$0xff]   ;;  %v1097_v55 = vld [vmem:[#allocation8 + $0x1e0] ss:$8 sps:$4 sm:$0xff]  }
  0x4e   :  { %672 = vmatprep.subr.bf16.mxu1 %v1051_v20  ;;  %636 = vmatpush1.bf16.msra.mxu0 %v1052_v21  ;;  %v1105_v56 = vld [vmem:[#allocation8 + $0x1d4] ss:$8 sps:$4 sm:$0xff]   ;;  %v1106_v57 = vld [vmem:[#allocation8 + $0xb0] ss:$8 sps:$4 sm:$0xff]   ;;  %v1107_v58 = vld [vmem:[#allocation8 + $0xa4] ss:$8 sps:$4 sm:$0xff]  }
  0x4f   :  { %637 = vmatprep.subr.bf16.mxu0 %v1053_v22  ;;  %v1103_v59 = vld [vmem:[#allocation8 + $0x1d0] ss:$8 sps:$4 sm:$0xff]   ;;  %v1111_v60 = vld [vmem:[#allocation8 + $0x1c4] ss:$8 sps:$4 sm:$0xff]   ;;  %v1112_v61 = vld [vmem:[#allocation8 + $0xa0] ss:$8 sps:$4 sm:$0xff]  }
  0x50   :  { %v1109_v62 = vld [vmem:[#allocation8 + $0x1c0] ss:$8 sps:$4 sm:$0xff]   ;;  %v1113_v63 = vld [vmem:[#allocation8 + $0x94] ss:$8 sps:$4 sm:$0xff]   ;;  %v1115_v1 = vld [vmem:[#allocation8 + $0x1b0] ss:$8 sps:$4 sm:$0xff]  }
  0x51   :  { %673 = vmatpush1.bf16.msra.mxu1 %v1049_v23  ;;  %v1117_v0 = vld [vmem:[#allocation8 + $0x1b4] ss:$8 sps:$4 sm:$0xff]   ;;  %v1118_v2 = vld [vmem:[#allocation8 + $0x90] ss:$8 sps:$4 sm:$0xff]   ;;  %v1119_v3 = vld [vmem:[#allocation8 + $0x84] ss:$8 sps:$4 sm:$0xff]  }
  0x52   :  { %674 = vmatprep.subr.bf16.mxu1 %v1057_v24  ;;  %638 = vmatpush1.bf16.msra.mxu0 %v1058_v25  ;;  %v1123_v4 = vld [vmem:[#allocation8 + $0x1a4] ss:$8 sps:$4 sm:$0xff]   ;;  %v1121_v5 = vld [vmem:[#allocation8 + $0x1a0] ss:$8 sps:$4 sm:$0xff]   ;;  %v1127_v7 = vld [vmem:[#allocation8 + $0x194] ss:$8 sps:$4 sm:$0xff]  }
  0x53   :  { %639 = vmatprep.subr.bf16.mxu0 %v1059_v26  ;;  %v1124_v6 = vld [vmem:[#allocation8 + $0x80] ss:$8 sps:$4 sm:$0xff]   ;;  %v1125_v8 = vld [vmem:[#allocation8 + $0x190] ss:$8 sps:$4 sm:$0xff]   ;;  %v1130_v9 = vld [vmem:[#allocation8 + $0x184] ss:$8 sps:$4 sm:$0xff]  }
  0x54   :  { %v1128_v10 = vld [vmem:[#allocation8 + $0x180] ss:$8 sps:$4 sm:$0xff]   ;;  %v1131_v11 = vld [vmem:[#allocation10 + $0x78] sm:$0xff]   ;;  %v1349_v13 = vshrl.u32 %v96_v12, 7  ;;  %s1249_s30 = scalar_lea.vmem %s899_s29, 128 }
  0x55   :  { %675 = vmatpush1.bf16.msra.mxu1 %v1055_v27  ;;  %v94_v15 = vld [vmem:[#allocation7] sm:$0xf]  ;;  %p1250_p11 = scmp.ne.s32.totalorder %s899_s29, %s1249_s30  ;;  %p1255_p13 = scmp.lt.s32.totalorder %s1249_s30, %s1249_s30 }
  0x56   :  { %676 = vmatprep.subr.bf16.mxu1 %v1063_v28  ;;  %640 = vmatpush1.bf16.msra.mxu0 %v1064_v29  ;;  %v98_v14 = vsub.s32 0, %v1349_v13  ;;  %v102_v16 = vsub.s32 1, %v1349_v13  ;;  %v106_v21 = vsub.s32 2, %v1349_v13  ;;  %v110_v24 = vsub.s32 3, %v1349_v13  ;;  %v981_v13 = vld [vmem:[%s1378_s6] ss:$0 sm:$0xff] }
  0x57   :  { %641 = vmatprep.subr.bf16.mxu0 %v1065_v30  ;;  %p1256_p0 = por %p1255_p13, %p1254_p12 }
  0x58   :  { %v99_v17 = vrot.slane %v94_v15, %v98_v14  ;;  %v103_v18 = vrot.slane %v94_v15, %v102_v16  ;;  %v107_v27 = vrot.slane %v94_v15, %v106_v21 }
  0x59   :  { %677 = vmatpush1.bf16.msra.mxu1 %v1061_v31  ;;  %v111_v31 = vrot.slane %v94_v15, %v110_v24  ;;  %p1257_p1 = pnand %p1256_p0, %p1250_p11 }
  0x5a   :  { %678 = vmatprep.subr.bf16.mxu1 %v1069_v32  ;;  %642 = vmatpush1.bf16.msra.mxu0 %v1070_v33  ;;  %v1132_v32 = vld [vmem:[#allocation10 + $0x38] sm:$0xff]  }
  0x5b   :  { %643 = vmatprep.subr.bf16.mxu0 %v1071_v34 }
  0x5d   :  { %679 = vmatpush1.bf16.msra.mxu1 %v1067_v35  ;;  %v1133_v35 = vld [vmem:[#allocation10 + $0x70] sm:$0xff]  }
  0x5e   :  { %680 = vmatprep.subr.bf16.mxu1 %v1075_v36  ;;  %644 = vmatpush1.bf16.msra.mxu0 %v1076_v37 }
  0x5f   :  { %645 = vmatprep.subr.bf16.mxu0 %v1077_v38 }
  0x61   :  { %681 = vmatpush1.bf16.msra.mxu1 %v1073_v39  ;;  %v1134_v39 = vld [vmem:[#allocation10 + $0x30] sm:$0xff]  }
  0x62   :  { %682 = vmatprep.subr.bf16.mxu1 %v1081_v40  ;;  %646 = vmatpush2.bf16.msra.mxu0 %v1082_v41 }
  0x63   :  { %647 = vmatprep.subr.bf16.mxu0 %v1083_v42  ;;  %v1135_v42 = vld [vmem:[#allocation10 + $0x68] sm:$0xff]  }
  0x65   :  { %683 = vmatpush1.bf16.msra.mxu1 %v1079_v43 }
  0x66   :  { %684 = vmatprep.subr.bf16.mxu1 %v1087_v44  ;;  %648 = vmatpush2.bf16.msra.mxu0 %v1088_v45 }
  0x67   :  { %649 = vmatprep.subr.bf16.mxu0 %v1089_v46  ;;  %v1136_v46 = vld [vmem:[#allocation10 + $0x28] sm:$0xff]  }
  0x69   :  { %685 = vmatpush1.bf16.msra.mxu1 %v1085_v47 }
  0x6a   :  { %686 = vmatprep.subr.bf16.mxu1 %v1093_v48  ;;  %650 = vmatpush2.bf16.msra.mxu0 %v1094_v49  ;;  %v1137_v48 = vld [vmem:[#allocation10 + $0x60] sm:$0xff]  }
  0x6b   :  { %651 = vmatprep.subr.bf16.mxu0 %v1095_v50  ;;  %v1138_v49 = vld [vmem:[#allocation10 + $0x20] sm:$0xff]   ;;  %v1139_v50 = vld [vmem:[#allocation10 + $0x58] sm:$0xff]  }
  0x6d   :  { %687 = vmatpush2.bf16.msra.mxu1 %v1091_v51  ;;  %v1140_v51 = vld [vmem:[#allocation10 + $0x18] sm:$0xff]  }
  0x6e   :  { %688 = vmatprep.subr.bf16.mxu1 %v1099_v52  ;;  %652 = vmatpush2.bf16.msra.mxu0 %v1100_v53  ;;  %v1141_v52 = vld [vmem:[#allocation10 + $0x50] sm:$0xff]  }
  0x6f   :  { %653 = vmatprep.subr.bf16.mxu0 %v1101_v54  ;;  %v1142_v53 = vld [vmem:[#allocation10 + $0x10] sm:$0xff]   ;;  %v1143_v54 = vld [vmem:[#allocation10 + $0x48] sm:$0xff]  }
  0x71   :  { %689 = vmatpush2.bf16.msra.mxu1 %v1097_v55  ;;  %v1144_v55 = vld [vmem:[#allocation10 + $0x8] sm:$0xff]  }
  0x72   :  { %690 = vmatprep.subr.bf16.mxu1 %v1105_v56  ;;  %654 = vmatpush2.bf16.msra.mxu0 %v1106_v57  ;;  %v1145_v56 = vld [vmem:[#allocation10 + $0x40] sm:$0xff]  }
  0x73   :  { %655 = vmatprep.subr.bf16.mxu0 %v1107_v58  ;;  %v1146_v57 = vld [vmem:[#allocation10] sm:$0xff]  }
  0x74   :  { %v297_v58 = vld [vmem:[%s1376_s4] sm:$0x3] }
  0x75   :  { %691 = vmatpush2.bf16.msra.mxu1 %v1103_v59 }
  0x76   :  { %692 = vmatprep.subr.bf16.mxu1 %v1111_v60  ;;  %656 = vmatpush2.bf16.msra.mxu0 %v1112_v61  ;;  %v302_v61 = vrot.slane %v297_v58, %v98_v14 }
  0x77   :  { %657 = vmatprep.subr.bf16.mxu0 %v1113_v63  ;;  %v306_v63 = vrot.slane %v297_v58, %v102_v16 }
  0x79   :  { %693 = vmatpush2.bf16.msra.mxu1 %v1109_v62 }
  0x7a   :  { %694 = vmatprep.subr.bf16.mxu1 %v1117_v0  ;;  %658 = vmatpush2.bf16.msra.mxu0 %v1118_v2 }
  0x7b   :  { %659 = vmatprep.subr.bf16.mxu0 %v1119_v3 }
  0x7d   :  { %695 = vmatpush2.bf16.msra.mxu1 %v1115_v1 }
  0x7e   :  { %696 = vmatprep.subr.bf16.mxu1 %v1123_v4  ;;  %660 = vmatpush2.bf16.msra.mxu0 %v1124_v6 }
  0x7f   :  { %998 = vmatprep.subr.bf16.mxu0 %v1131_v11 }
  0x81   :  { %697 = vmatpush2.bf16.msra.mxu1 %v1121_v5 }
  0x82   :  { %698 = vmatprep.subr.bf16.mxu1 %v1127_v7 }
  0x85   :  { %699 = vmatpush2.bf16.msra.mxu1 %v1125_v8 }
  0x86   :  { %700 = vmatprep.subr.bf16.mxu1 %v1130_v9 }
  0x89   :  { %701 = vmatpush2.bf16.msra.mxu1 %v1128_v10 }
 0x104   :  { %v177_v19 = vpop.f32.mrf.mxu1 }
 0x105   :  { %v178_v20 = vadd.f32 %v177_v19, %v99_v17 }
 0x106   :  { %v179_v22 = vpop.f32.mrf.mxu1 }
 0x107   :  { %v180_v23 = vadd.f32 %v179_v22, %v103_v18  ;;  %v225_v25 = vmax.f32 %v178_v20, 0.0 }
 0x108   :  { %v181_v26 = vpop.f32.mrf.mxu1 }
 0x109   :  { %v226_v28 = vmax.f32 %v180_v23, 0.0  ;;  %v229_v33 = vpack.c.bf16 %v225_v25, %v225_v25 }
 0x10a   :  { %v182_v29 = vpop.f32.mrf.mxu1 }
 0x10b   :  { %v230_v30 = vpack.c.bf16 %v226_v28, %v226_v28 }
 0x10c   :  { %v218_v34 = vpop.f32.mrf.mxu1 }
 0x10d   :  { %v219_v36 = vadd.f32 %v218_v34, %v107_v27  ;;  %661 = vmatprep.mubr.bf16.mxu0 %v230_v30 }
 0x10e   :  { %v220_v37 = vpop.f32.mrf.mxu1  ;;  %662 = vmatmul.mubr.bf16.vlgmr.msra.gmra.mxu0 %v229_v33 }
 0x10f   :  { %v221_v38 = vadd.f32 %v220_v37, %v111_v31  ;;  %999 = vmatpush3.bf16.msra.mxu0 %v1132_v32  ;;  %v227_v40 = vmax.f32 %v219_v36, 0.0 }
 0x110   :  { %v222_v41 = vpop.f32.mrf.mxu1  ;;  %1000 = vmatprep.subr.bf16.mxu0 %v1133_v35 }
 0x111   :  { %v228_v43 = vmax.f32 %v221_v38, 0.0  ;;  %v231_v47 = vpack.c.bf16 %v227_v40, %v227_v40 }
 0x112   :  { %v223_v44 = vpop.f32.mrf.mxu1 }
 0x113   :  { %v232_v45 = vpack.c.bf16 %v228_v43, %v228_v43  ;;  %1001 = vmatpush3.bf16.msra.mxu0 %v1134_v39 }
 0x114   :  { %1002 = vmatprep.subr.bf16.mxu0 %v1135_v42 }
 0x115   :  { %702 = vmatprep.mubr.bf16.mxu1 %v232_v45 }
 0x116   :  { %703 = vmatmul.mubr.bf16.vlgmr.msra.gmra.mxu1 %v231_v47 }
 0x117   :  { %1003 = vmatpush3.bf16.msra.mxu0 %v1136_v46 }
 0x118   :  { %1004 = vmatprep.subr.bf16.mxu0 %v1137_v48 }
 0x11b   :  { %1005 = vmatpush3.bf16.msra.mxu0 %v1138_v49 }
 0x11c   :  { %1006 = vmatprep.subr.bf16.mxu0 %v1139_v50 }
 0x11f   :  { %1007 = vmatpush3.bf16.msra.mxu0 %v1140_v51 }
 0x120   :  { %1008 = vmatprep.subr.bf16.mxu0 %v1141_v52 }
 0x123   :  { %1009 = vmatpush3.bf16.msra.mxu0 %v1142_v53 }
 0x124   :  { %1010 = vmatprep.subr.bf16.mxu0 %v1143_v54 }
 0x127   :  { %1011 = vmatpush3.bf16.msra.mxu0 %v1144_v55 }
 0x128   :  { %1012 = vmatprep.subr.bf16.mxu0 %v1145_v56 }
 0x12b   :  { %1013 = vmatpush3.bf16.msra.mxu0 %v1146_v57 }
 0x1ce   :  { %v663_v59 = vpop.f32.mrf.mxu0 }
 0x1cf   :  { %v664_v1 = vadd.f32 %v663_v59, %v302_v61 }
 0x1d0   :  { %v665_v60 = vpop.f32.mrf.mxu0 }
 0x1d1   :  { %v666_v3 = vadd.f32 %v665_v60, %v306_v63 }
 0x1d2   :  { %v667_v62 = vpop.f32.mrf.mxu0 }
 0x1d4   :  { %v668_v0 = vpop.f32.mrf.mxu0 }
 0x1d6   :  { %v704_v2 = vpop.f32.mrf.mxu1 }
 0x1d7   :  { %v705_v4 = vadd.f32 %v704_v2, %v664_v1 }
 0x1d8   :  { %v706_v5 = vpop.f32.mrf.mxu1 }
 0x1d9   :  { %v707_v6 = vadd.f32 %v706_v5, %v666_v3  ;;  %v711_v7 = vmax.f32 %v705_v4, 0.0 }
 0x1da   :  { %v708_v8 = vpop.f32.mrf.mxu1 }
 0x1db   :  { %v712_v9 = vmax.f32 %v707_v6, 0.0  ;;  %v713_v12 = vpack.c.bf16 %v711_v7, %v711_v7 }
 0x1dc   :  { %v709_v10 = vpop.f32.mrf.mxu1 }
 0x1dd   :  { %v714_v11 = vpack.c.bf16 %v712_v9, %v712_v9 }
 0x1df   :  { %882 = vmatprep.mubr.bf16.mxu0 %v714_v11 }
 0x1e0   :  { %883 = vmatmul.mubr.bf16.vlgmr.msra.gmra.mxu0 %v713_v12 }
 0x2a0   :  { %v1014_v14 = vpop.f32.mrf.mxu0 }
 0x2a2   :  { %v1015_v15 = vpop.f32.mrf.mxu0 }
 0x2a3   :  { %v1016_v16 = vadd.f32 %v1015_v15, %v1014_v14 }
 0x2a4   :  { %v1017_v17 = vpop.f32.mrf.mxu0 }
 0x2a5   :  { %v885_v18 = vadd.f32 %v1016_v16, %v981_v13 }
 0x2a6   :  { %v1018_v19 = vpop.f32.mrf.mxu0 }
 0x2a7   :  { %1147 = vtanh.f32 %v885_v18 }
 0x2b4   :  { %v1148_v20 = vpop.eup %1147 }
 0x2b5   :  { %891 = vst [vmem:[#allocation11] sm:$0xff] %v1148_v20 }
 0x2b6   :  { %1260 = shalt.err (!%p1257_p1)
}
 0x2b7   :  { %901 = dma.vmem_to_hbm [thread:$0]  %s899_s29, 128, %s1379_s7, [#allocation4]  }
 0x2b8   :  { %1275 = dma.done.wait [#allocation4], 128  }
 0x2b9   :  { %1276 = vsyncadd [#allocation4], 4294967168 }
 0x2ba   :  { %905 = vsyncpa [#allocation3], 1 }
 0x2bb   :  { %906 = vsyncpa [#allocation6], 1 }
 0x2bc   :  { %907 = vsyncpa [#allocation9], 1 }
 0x2bd   :  { %908 = vsyncpa [#allocation4], 1 }

</bundles_post_ra>
